<compile_context>
chip_gen: v5e
topology: v5e:2x2
jax: 0.10.0
libtpu: 0.0.40
codegen_flags: <defaults>
</compile_context>

<pallas_src>
import math

import jax
import jax.numpy as jnp
from jax.experimental import pallas as pl
from jax.experimental.pallas import tpu as pltpu

_HALF_LOG_2PI = 0.5 * math.log(2.0 * math.pi)

_LANE = 128
_SUBLANE = 8
_MAX_TILE_P = 2048                    # lane-block cap (multiple of 128)
_MAX_TILE_B = 512                     # row-block cap (multiple of 8)
_TILE_BYTES_PER_STREAM = 1 << 20      # ~1 MiB f32 per stream tile


def _round_up(x, m):
    return ((x + m - 1) // m) * m


def _inference_normal_kernel(params_ref, obs_ref, eps_ref, sample_ref, logprob_ref):
    # params (SMEM f32[4]): [mult, bias, std, neg_log_norm]
    mult = params_ref[0]
    bias = params_ref[1]
    std = params_ref[2]
    neg_log_norm = params_ref[3]              # -(log_std + 0.5*log(2*pi))

    loc = mult * obs_ref[...] + bias          # [tile_b, 1], lane-broadcast below
    eps = eps_ref[...]                        # [tile_b, tile_p] standard-normal noise

    sample_ref[...] = loc + std * eps                     # Normal.rsample()
    logprob_ref[...] = neg_log_norm - 0.5 * (eps * eps)   # Normal.log_prob(sample)


def _choose_tiles(batch, p):
    # Particle (lane) axis: use the full dim when it fits a lane-block cap
    # (a block dim equal to the full array dim is legal even if not %128);
    # otherwise use 128-multiple blocks and let Pallas mask the ragged edge.
    tile_p = p if p <= _MAX_TILE_P else _MAX_TILE_P

    # Row (sublane) axis: multiple of 8, capped by (a) ~1 MiB per-stream tile,
    # (b) 512 rows, (c) half the batch so grid >= 2 (v7x 2-TC sharding +
    # prefetch/store overlap). Tiny batches use the full dim (legal).
    if batch <= _SUBLANE:
        tile_b = batch
    else:
        rows_budget = max(
            _SUBLANE,
            (_TILE_BYTES_PER_STREAM // (tile_p * 4)) // _SUBLANE * _SUBLANE,
        )
        half_batch = max(_SUBLANE, _round_up(-(-batch // 2), _SUBLANE))
        tile_b = min(rows_budget, _MAX_TILE_B, half_batch, _round_up(batch, _SUBLANE))
    return tile_b, tile_p


def inference_network_forward(mult, bias, log_std, observations, eps):
    """Pallas forward of InferenceNetwork + the Normal ops used downstream.

    observations[0]: [batch] float32
    eps:             [batch, num_particles] float32 standard-normal noise
    Returns (sample, log_prob), both [batch, num_particles] float32.
    """
    obs = jnp.asarray(observations[0], dtype=jnp.float32)
    eps = jnp.asarray(eps, dtype=jnp.float32)
    batch, p = eps.shape

    mult = jnp.asarray(mult, dtype=jnp.float32)
    bias = jnp.asarray(bias, dtype=jnp.float32)
    log_std = jnp.asarray(log_std, dtype=jnp.float32)
    std = jnp.exp(log_std)                                # scale = exp(log_std)
    neg_log_norm = -(log_std + jnp.float32(_HALF_LOG_2PI))
    params = jnp.stack([mult, bias, std, neg_log_norm]).astype(jnp.float32)

    obs2d = obs.reshape(batch, 1)                         # metadata-only reshape

    tile_b, tile_p = _choose_tiles(batch, p)
    grid = (pl.cdiv(batch, tile_b), pl.cdiv(p, tile_p))

    out_shapes = (
        jax.ShapeDtypeStruct((batch, p), jnp.float32),
        jax.ShapeDtypeStruct((batch, p), jnp.float32),
    )

    sample, log_prob = pl.pallas_call(
        _inference_normal_kernel,
        out_shape=out_shapes,
        grid=grid,
        in_specs=[
            pl.BlockSpec(memory_space=pltpu.MemorySpace.SMEM),      # packed scalars
            pl.BlockSpec((tile_b, 1), lambda i, j: (i, 0)),         # observations[0]
            pl.BlockSpec((tile_b, tile_p), lambda i, j: (i, j)),    # eps
        ],
        out_specs=(
            pl.BlockSpec((tile_b, tile_p), lambda i, j: (i, j)),    # sample
            pl.BlockSpec((tile_b, tile_p), lambda i, j: (i, j)),    # log_prob
        ),
        compiler_params=pltpu.CompilerParams(
            dimension_semantics=("parallel", "parallel"),           # v7x 2-TC sharding
        ),
    )(params, obs2d, eps)

    return sample, log_prob


if __name__ == "__main__":
    # Deterministic parameters matching InferenceNetwork(init_mult, init_bias, init_std).
    init_mult, init_bias, init_std = 0.5, -0.3, 1.2
    mult = jnp.float32(init_mult)
    bias = jnp.float32(init_bias)
    log_std = jnp.log(jnp.float32(init_std))

    # aesmc-style small shapes: 16 batch elements, 100 particles (not a multiple of 128).
    batch, num_particles = 16, 100
    key = jax.random.PRNGKey(0)
    k_obs, k_eps = jax.random.split(key)
    obs = jax.random.normal(k_obs, (batch,), dtype=jnp.float32)
    eps = jax.random.normal(k_eps, (batch, num_particles), dtype=jnp.float32)

    sample, log_prob = inference_network_forward(mult, bias, log_std, [obs], eps)
    jax.block_until_ready((sample, log_prob))

    # Reference check (same math as torch.distributions.Normal).
    std = jnp.exp(log_std)
    loc = mult * obs + bias
    ref_sample = loc[:, None] + std * eps
    ref_logprob = (
        -0.5 * ((ref_sample - loc[:, None]) / std) ** 2
        - jnp.log(std)
        - 0.5 * jnp.log(2.0 * jnp.pi)
    )
    assert sample.shape == (batch, num_particles)
    assert log_prob.shape == (batch, num_particles)
    assert jnp.allclose(sample, ref_sample, atol=1e-5, rtol=1e-5)
    assert jnp.allclose(log_prob, ref_logprob, atol=1e-5, rtol=1e-5)

    print("KERNEL_OK")
</pallas_src>

<mosaic_0001>
module attributes {stable_mosaic.version = 11 : i64} {
  func.func @_inference_normal_kernel(%arg0: i32, %arg1: i32, %arg2: memref<4xf32, #tpu.memory_space<smem>>, %arg3: memref<8x1xf32, #tpu.memory_space<vmem>>, %arg4: memref<8x100xf32, #tpu.memory_space<vmem>>, %arg5: memref<8x100xf32, #tpu.memory_space<vmem>>, %arg6: memref<8x100xf32, #tpu.memory_space<vmem>>) attributes {dimension_semantics = [#tpu.dimension_semantics<parallel>, #tpu.dimension_semantics<parallel>], iteration_bounds = array<i64: 2, 1>, scalar_prefetch = 0 : i64, scratch_operands = 0 : i64, tpu.core_type = #tpu.core_type<tc>, window_params = [{transform_indices = @transform_0, window_bounds = array<i64: 4>}, {transform_indices = @transform_1, window_bounds = array<i64: 8, 1>}, {transform_indices = @transform_2, window_bounds = array<i64: 8, 100>}, {transform_indices = @transform_3, window_bounds = array<i64: 8, 100>}, {transform_indices = @transform_4, window_bounds = array<i64: 8, 100>}]} {
    %c0 = arith.constant 0 : index
    %0 = memref.load %arg2[%c0] : memref<4xf32, #tpu.memory_space<smem>>
    %c1 = arith.constant 1 : index
    %1 = memref.load %arg2[%c1] : memref<4xf32, #tpu.memory_space<smem>>
    %c2 = arith.constant 2 : index
    %2 = memref.load %arg2[%c2] : memref<4xf32, #tpu.memory_space<smem>>
    %c3 = arith.constant 3 : index
    %3 = memref.load %arg2[%c3] : memref<4xf32, #tpu.memory_space<smem>>
    %c0_0 = arith.constant 0 : index
    %c0_1 = arith.constant 0 : index
    %4 = vector.load %arg3[%c0_0, %c0_1] : memref<8x1xf32, #tpu.memory_space<vmem>>, vector<8x1xf32>
    %5 = vector.broadcast %0 : f32 to vector<8x1xf32>
    %6 = arith.mulf %5, %4 : vector<8x1xf32>
    %7 = vector.broadcast %1 : f32 to vector<8x1xf32>
    %8 = arith.addf %6, %7 : vector<8x1xf32>
    %c0_2 = arith.constant 0 : index
    %c0_3 = arith.constant 0 : index
    %9 = vector.load %arg4[%c0_2, %c0_3] : memref<8x100xf32, #tpu.memory_space<vmem>>, vector<8x100xf32>
    %10 = vector.broadcast %2 : f32 to vector<8x100xf32>
    %11 = arith.mulf %10, %9 : vector<8x100xf32>
    %12 = vector.broadcast %8 : vector<8x1xf32> to vector<8x100xf32>
    %13 = arith.addf %12, %11 : vector<8x100xf32>
    %c0_4 = arith.constant 0 : index
    %c0_5 = arith.constant 0 : index
    %14 = vector.load %arg5[%c0_4, %c0_5] : memref<8x100xf32, #tpu.memory_space<vmem>>, vector<8x100xf32>
    tpu.vector_store %arg5[%c0_4, %c0_5], %13 {strides = array<i32>} : memref<8x100xf32, #tpu.memory_space<vmem>>, vector<8x100xf32>,
    %15 = arith.mulf %9, %9 : vector<8x100xf32>
    %cst = arith.constant 5.000000e-01 : f32
    %16 = vector.broadcast %cst : f32 to vector<8x100xf32>
    %17 = arith.mulf %16, %15 : vector<8x100xf32>
    %18 = vector.broadcast %3 : f32 to vector<8x100xf32>
    %19 = arith.subf %18, %17 : vector<8x100xf32>
    %c0_6 = arith.constant 0 : index
    %c0_7 = arith.constant 0 : index
    %20 = vector.load %arg6[%c0_6, %c0_7] : memref<8x100xf32, #tpu.memory_space<vmem>>, vector<8x100xf32>
    tpu.vector_store %arg6[%c0_6, %c0_7], %19 {strides = array<i32>} : memref<8x100xf32, #tpu.memory_space<vmem>>, vector<8x100xf32>,
    return
  }
  func.func @transform_0(%arg0: i32, %arg1: i32) -> i32 {
    %c0_i32 = arith.constant 0 : i32
    %c0_i32_0 = arith.constant 0 : i32
    return %c0_i32 : i32
  }
  func.func @transform_1(%arg0: i32, %arg1: i32) -> (i32, i32) {
    %c0_i32 = arith.constant 0 : i32
    %c0_i32_0 = arith.constant 0 : i32
    return %arg0, %c0_i32 : i32, i32
  }
  func.func @transform_2(%arg0: i32, %arg1: i32) -> (i32, i32) {
    %c0_i32 = arith.constant 0 : i32
    return %arg0, %arg1 : i32, i32
  }
  func.func @transform_3(%arg0: i32, %arg1: i32) -> (i32, i32) {
    %c0_i32 = arith.constant 0 : i32
    return %arg0, %arg1 : i32, i32
  }
  func.func @transform_4(%arg0: i32, %arg1: i32) -> (i32, i32) {
    %c0_i32 = arith.constant 0 : i32
    return %arg0, %arg1 : i32, i32
  }
}

</mosaic_0001>

<bundles_post_ra>
// kernel: tpu_custom_call.1
= control target key start
LH: loop header
LB: loop body
LE: loop exit
PB: predicated region body
PF: predicated region fallthrough
CT: control target
= control target key end

     0   :  { %10 = vsyncpa [#allocation4], 0  ;;  %s831_s0 = inlined_call_operand.vmem [shape: f32[4], index: 0, kind: input, shape index: {}]   ;;  %s832_s1 = inlined_call_operand.vmem [shape: f32[16,1], index: 1, kind: input, shape index: {}]   ;;  %s833_s2 = inlined_call_operand.vmem [shape: f32[16,100], index: 2, kind: input, shape index: {}]   ;;  %s834_s3 = inlined_call_operand.hbm [shape: f32[16,100], index: 3, kind: output, shape index: {0}]   ;;  %s835_s4 = inlined_call_operand.hbm [shape: f32[16,100], index: 4, kind: output, shape index: {1}]  }
   0x1   :  { %11 = vsyncpa [#allocation3], 0 }
   0x2   :  { %13 = vsyncpa [#allocation3 + $0x1], 0 }
   0x3   :  { %14 = vsyncpa [#allocation7], 0 }
   0x4   :  { %16 = vsyncpa [#allocation7 + $0x1], 0  ;;  %s704_s15 = smov 0   ;;  %s706_s16 = smov 0  }
   0x5   :  { %s708_s17 = smov 0   ;;  %s710_s18 = smov 0  }
   0x6   :  { %s712_s19 = smov 0   ;;  %s714_s20 = smov 0  }
   0x7 LB: > { %s453_s21 = sadd.s32 4294967295, %s675_s20   ;;  %s454_s22 = sadd.s32 4294967294, %s675_s20   ;;  %s675_s20 = sphi %s714_s20, %s22_s20   ;;  %s671_s19 = sphi %s712_s19, %s842_s19   ;;  %s667_s18 = sphi %s710_s18, %s841_s18   ;;  %s663_s17 = sphi %s708_s17, %s840_s17   ;;  %s659_s16 = sphi %s706_s16, %s839_s16   ;;  %s655_s15 = sphi %s704_s15, %s838_s15  }
   0x8   : > { %s34_s23 = sadd.s32 1, %s671_s19  ;;  %s118_s24 = sadd.s32 1, %s663_s17 }
   0x9   : > { %p36_p0 = scmp.ge.s32.totalorder %s34_s23, 2  ;;  %p128_p1 = scmp.ne.s32.totalorder %s663_s17, %s659_s16 }
   0xa   : > { %p129_p2 = scmp.eq.s32.totalorder %s453_s21, 1  ;;  %p134_p3 = scmp.ne.s32.totalorder %s659_s16, %s655_s15 }
   0xb   : > { %s844_s23 = smov (%p36_p0, %s34_s23), 0  ;;  %p135_p5 = scmp.eq.s32.totalorder %s454_s22, 1 }
   0xc   : > { %p744_p4 = por %p129_p2, %p128_p1  ;;  %s113_s26 = ssub.s32 %s671_s19, %s844_s23 }
   0xd   : > { %p455_p6 = scmp.ge.s32.totalorder %s675_s20, 1  ;;  %p116_p7 = scmp.eq.s32.totalorder %s113_s26, 0 }
   0xe   : > { %p751_p8 = por %p135_p5, %p134_p3  ;;  %p170_p9 = scmp.lt.s32.totalorder %s675_s20, 3 }
   0xf   : > { %s757_s28 = scalar_select %p116_p7, %s663_s17, %s118_s24  }
  0x10   : > { %p171_p10 = pnand %p455_p6, %p170_p9  ;;  %p492_p11 = scmp.eq.s32.totalorder %s453_s21, 0 }
  0x11   : > { %s182_s5 = sshll.u32 %s831_s0, 4  ;;  %s677_s6 = smov [#allocation2]   ;;  %s183_s5 = int_to_ptr.vmem [resolvable:$true] %s182_s5 }
  0x12   : > { %p481_p12 = pneg %p171_p10  ;;  %212 = sbr.rel (%p171_p10) target bundleno = 157 (0x9d), region = 32 }
  0x14   : > { %p482_p13 = pnand %p492_p11, %p481_p12 }
  0x16   : > { %484 = dma.vmem_to_smem (!%p482_p13), %s183_s5, 16, %s677_s6, [#allocation4]  }
  0x17   : > { %642 = dma.done.wait (%p492_p11), [#allocation4], 16  }
  0x18   : > { %644 = vsyncadd (%p492_p11), [#allocation4], 4294967280 }
  0x19   : > { %219 = sfence }
  0x1a   : > { %p251_p0 = scmp.lt.s32.totalorder %s667_s18, 1  ;;  %s262_s7 = sld [smem:[#allocation2]]  ;;  %v678_v0 = vmov 0   ;;  %vm280_vm0 = vcmask 818176  }
  0x1b   : > { %545 = vset.pattern.permute.xlu0 %v678_v0  ;;  %s464_s8 = sld [smem:[#allocation2 + $0x1]]  ;;  %s771_s26 = sand.u32 1, %s659_s16  }
  0x1c   : > { %s252_s9 = scalar_select %p251_p0, %s667_s18, 1 }
  0x1d   : > { %s466_s24 = sld [smem:[#allocation2 + $0x3]]  ;;  %s460_s29 = sshll.u32 %s771_s26, 3 }
  0x1e   : > { %s462_s10 = sshll.u32 %s252_s9, 3  ;;  %s469_s30 = sshll.u32 %s667_s18, 3 }
  0x1f   : > { %s254_s13 = scalar_lea.vmem %s832_s1, %s462_s10  ;;  %s261_s22 = scalar_lea.vmem %s833_s2, %s462_s10 }
  0x20   : > { %v266_v1 = vld [vmem:[%s254_s13] sm:$0xff]  ;;  %v267_v2 = vstv %s262_s7  ;;  %s319_s7 = scalar_lea.hbm %s835_s4, %s469_s30  ;;  %s293_s11 = scalar_lea.sflag [#allocation7], %s771_s26 }
  0x21   : > { %v268_v3 = vmul.f32 %v267_v2, %v266_v1  ;;  %v269_v4 = vstv %s464_s8  ;;  %v271_v6 = vld [vmem:[%s261_s22] sm:$0xff]  ;;  %s250_s8 = scalar_lea.vmem [#allocation6], %s460_s29  ;;  %s323_s10 = sshll.u32 %s319_s7, 4  ;;  %s324_s10 = int_to_ptr.hbm [resolvable:$true] %s323_s10 }
  0x22   : > { %v282_v7 = vmul.f32 %v271_v6, %v271_v6  ;;  %s321_s9 = sshll.u32 %s250_s8, 4  ;;  %s575_s12 = sshra.s32 %s324_s10, 4  ;;  %s322_s9 = int_to_ptr.vmem [resolvable:$true] %s321_s9  ;;  %s576_s12 = int_to_ptr.hbm [resolvable:$true] %s575_s12 }
  0x23   : > { %v270_v5 = vadd.f32 %v269_v4, %v268_v3  ;;  %v284_v9 = vstv %s466_s24  ;;  %s577_s18 = scalar_lea.hbm %s576_s12, 8  ;;  %s581_s21 = scalar_lea.hbm %s835_s4, 16 }
  0x24   : > { %v283_v8 = vmul.f32 0.5, %v282_v7  ;;  %p578_p1 = scmp.ne.s32.totalorder %s576_s12, %s577_s18  ;;  %p582_p5 = scmp.lt.s32.totalorder %s576_s12, %s835_s4 }
  0x25   : > { %276 = vperm.xlu0 %545, %v270_v5   ;;  %p583_p6 = scmp.lt.s32.totalorder %s581_s21, %s577_s18 }
  0x26   : > { %v285_v10 = vsub.f32 %v284_v9, %v283_v8  ;;  %p579_p2 = pnand %p578_p1, %p744_p4 }
  0x27   : > { %p584_p7 = por %p583_p6, %p582_p5 }
  0x28   : > { %286 = vst.msk [vmem:[%s250_s8] sm:$0xff] %vm280_vm0, %v285_v10  ;;  %p580_p3 = pneg %p579_p2 }
  0x2a   : > { %p585_p9 = pnand %p584_p7, %p580_p3 }
  0x2c   : > { %588 = shalt.err (!%p585_p9)
}
  0x2d   : > { %478 = dma.vmem_to_hbm [thread:$0]  (%p744_p4), %s322_s9, 128, %s324_s10, %s293_s11  }
  0x2e   : > { %s465_s5 = sld [smem:[#allocation2 + $0x2]]  ;;  %s304_s8 = scalar_lea.hbm %s834_s3, %s469_s30 }
  0x2f   : > { %s243_s13 = scalar_lea.vmem [#allocation5], %s460_s29  ;;  %s308_s18 = sshll.u32 %s304_s8, 4  ;;  %s309_s18 = int_to_ptr.hbm [resolvable:$true] %s308_s18 }
  0x30   : > { %s306_s12 = sshll.u32 %s243_s13, 4  ;;  %s288_s14 = scalar_lea.sflag [#allocation3], %s771_s26  ;;  %s307_s12 = int_to_ptr.vmem [resolvable:$true] %s306_s12 }
  0x31   : > { %s603_s9 = sshra.s32 %s309_s18, 4  ;;  %s609_s29 = scalar_lea.hbm %s834_s3, 16  ;;  %s604_s9 = int_to_ptr.hbm [resolvable:$true] %s603_s9 }
  0x32   : > { %s605_s10 = scalar_lea.hbm %s604_s9, 8  ;;  %p610_p13 = scmp.lt.s32.totalorder %s604_s9, %s834_s3 }
  0x33   : > { %p606_p10 = scmp.ne.s32.totalorder %s604_s9, %s605_s10  ;;  %p611_p0 = scmp.lt.s32.totalorder %s609_s29, %s605_s10 }
  0x34   : > { %v272_v11 = vstv %s465_s5 }
  0x35   : > { %v273_v12 = vmul.f32 %v272_v11, %v271_v6  ;;  %p607_p11 = pnand %p606_p10, %p744_p4  ;;  %p612_p1 = por %p611_p0, %p610_p13 }
  0x37   : > { %p608_p12 = pneg %p607_p11 }
  0x39   : > { %p613_p2 = pnand %p612_p1, %p608_p12 }
  0x97   : > { %v277_v13 = vpop.permute.xlu0 %276 }
  0x98   : > { %v279_v14 = vadd.f32 %v277_v13, %v273_v12 }
  0x9a   : > { %281 = vst.msk [vmem:[%s243_s13] sm:$0xff] %vm280_vm0, %v279_v14 }
  0x9b   : > { %616 = shalt.err (!%p613_p2)
}
  0x9c   : > { %477 = dma.vmem_to_hbm [thread:$0]  (%p744_p4), %s307_s12, 128, %s309_s18, %s288_s14  }
  0x9d PF: > { %p494_p3 = scmp.ge.s32.totalorder %s675_s20, 2  ;;  %s335_s26 = sand.u32 1, %s655_s15  }
  0x9e   : > { %s336_s24 = scalar_lea.sflag [#allocation3], %s335_s26 }
  0x9f   : > { %p486_p5 = pnand %p494_p3, %p751_p8 }
  0xa1   : > { %p487_p6 = pneg %p486_p5 }
  0xa3   : > { %646 = dma.done.wait (%p487_p6), %s336_s24, 128  }
  0xa4   : > { %648 = vsyncadd (%p487_p6), %s336_s24, 4294967168  ;;  %s346_s5 = scalar_lea.sflag [#allocation7], %s335_s26 }
  0xa5   : > { %650 = dma.done.wait (%p487_p6), %s346_s5, 128  }
  0xa6   : > { %652 = vsyncadd (%p487_p6), %s346_s5, 4294967168  ;;  %s22_s20 = sadd.s32 1, %s675_s20   ;;  %s838_s15 = smov %s659_s16 }
  0xa7   : > { %p19_p7 = scmp.ge.s32.totalorder %s22_s20, 4   ;;  %s839_s16 = smov %s663_s17 }
  0xa8   : > { %s840_s17 = smov %s757_s28  ;;  %s841_s18 = smov %s671_s19 }
  0xa9   : > { %s842_s19 = smov %s844_s23  ;;  %21 = sbr.rel (!%p19_p7) target bundleno = 7 (0x7), region = 92 }
  0xae   :  { %352 = vsyncpa [#allocation3], 1 }
  0xaf   :  { %354 = vsyncpa [#allocation3 + $0x1], 1 }
  0xb0   :  { %355 = vsyncpa [#allocation7], 1 }
  0xb1   :  { %357 = vsyncpa [#allocation7 + $0x1], 1 }
  0xb2   :  { %358 = vsyncpa [#allocation4], 1 }
  0xb3   :  { %360 = vsyncpa [#allocation4 + $0x1], 1 }

</bundles_post_ra>
